<compile_context>
chip_gen: v5e
topology: v5e:2x2
jax: 0.10.0
libtpu: 0.0.40
codegen_flags: <defaults>
</compile_context>

<pallas_src>
import functools

import jax
import jax.numpy as jnp
from jax.experimental import pallas as pl
from jax.experimental.pallas import tpu as pltpu


def _round_up(n, m):
    return ((n + m - 1) // m) * m


def _vmem_caps():
    """Returns (vmem_limit ceiling for Mosaic, working-set budget for tiling)."""
    try:
        phys = int(pltpu.get_tpu_info().vmem_capacity_bytes)
    except Exception:
        phys = 64 * 1024 * 1024          # conservative default (v7x per-TC VMEM)
    # Never hand the kernel all of physical VMEM: leave headroom for compiler
    # internal scratch, semaphores and pipelining slack.
    limit = max(32 << 20, min(int(phys * 0.85), phys - (8 << 20)))
    budget = max(24 << 20, limit - (6 << 20))
    return limit, budget


def _gram_kernel(f_ref, g_ref, *, inv_denom, k_valid, tm, n_row_tiles,
                 compute_dtype):
    """Accumulate F @ F.T over the k grid axis into the resident g_ref block.

    f_ref: (rows, tk) slab of features (ALL rows, current k window) — the only
           streamed input; it serves as both matmul operands.
    g_ref: (tm, rows) f32 output block, resident across the k axis.
    """
    i = pl.program_id(0)
    k = pl.program_id(1)
    tk = f_ref.shape[-1]
    mask_tail = (k_valid % tk) != 0          # static Python bool

    @pl.when(k == 0)
    def _():
        g_ref[...] = jnp.zeros_like(g_ref)

    def _masked(v):
        # Zero the K tail of a boundary block (garbage beyond the array edge).
        if not mask_tail:
            return v
        col = jax.lax.broadcasted_iota(jnp.int32, v.shape, 1)
        return jnp.where(col < (k_valid - k * tk), v, jnp.zeros_like(v))

    slab = _masked(f_ref[...]).astype(compute_dtype)   # VPU cast hides under MXU
    if n_row_tiles == 1:
        lhs = slab                                     # slab used for both operands
    else:
        row0 = pl.multiple_of(i * tm, tm)              # aligned row-tile slice
        lhs = _masked(f_ref[pl.ds(row0, tm), :]).astype(compute_dtype)

    # Contract the last dim of both operands -> transposed-RHS matmul on the MXU.
    g_ref[...] += jax.lax.dot_general(
        lhs, slab,
        dimension_numbers=(((1,), (1,)), ((), ())),
        preferred_element_type=jnp.float32)

    @pl.when(k == pl.num_programs(1) - 1)
    def _():
        g_ref[...] *= inv_denom                        # gram_matrix: / (a*b*c*d)


def gram_matrix(x, *, compute_dtype=jnp.bfloat16, vmem_budget_bytes=None):
    """Pallas gram matrix of an NCHW tensor: (F @ F.T) / (a*b*c*d), f32 (M, M)."""
    a, b, c, d = x.shape
    M, K = a * b, c * d
    inv_denom = 1.0 / float(a * b * c * d)

    f = x.reshape(M, K)                       # contiguous -> free metadata reshape
    in_bytes = jnp.dtype(f.dtype).itemsize

    if K < 128:                               # keep block dims <= array dims
        f = jnp.pad(f, ((0, 0), (0, 128 - K)))   # zeros: exact for a gram
        K = 128

    vmem_limit_cap, budget = _vmem_caps()
    if vmem_budget_bytes is not None:         # test/benchmark override (tiling only)
        budget = int(vmem_budget_bytes)

    tk_cap = min(8192, (K // 128) * 128)      # big k-tiles: fewer grid steps,
                                              # longer DMA bursts, amortized RMW

    def _pick_tk(rows, out_rows, out_cols):
        avail = budget - 2 * out_rows * out_cols * 4        # conservative 2x out
        if avail <= 0:
            return 0
        tk_fit = (avail // (2 * rows * in_bytes)) // 128 * 128   # 2x: double buffer
        return min(tk_cap, tk_fit)

    # ---- Path A: single row tile -> F is streamed from HBM exactly once. ----
    rows, tm, n_row_tiles = M, M, 1
    tk = _pick_tk(M, M, M)

    if tk < 128:
        # ---- Path B: row-tiled fallback for large M. -------------------------
        tm = None
        for tm_try in (256, 128):
            pad_m = _round_up(M, tm_try)
            tk_try = _pick_tk(pad_m, tm_try, pad_m)
            if tk_try >= 128:
                tm, tk = tm_try, tk_try
                break
        if tm is None:                        # absurdly large M: exceed budget, try anyway
            tm, tk = 128, 128
        pad_m = _round_up(M, tm)
        if pad_m != M:
            f = jnp.pad(f, ((0, pad_m - M), (0, 0)))    # zero rows: exact for a gram
        rows, n_row_tiles = pad_m, pad_m // tm

    k_tiles = -(-K // tk)

    # Only ask Mosaic for roughly what we will use (never above the HW-derived cap).
    footprint = 2 * rows * tk * in_bytes + 2 * tm * rows * 4
    vmem_limit = int(min(vmem_limit_cap, max(2 * footprint, 32 << 20)))

    kernel = functools.partial(
        _gram_kernel, inv_denom=inv_denom, k_valid=K, tm=tm,
        n_row_tiles=n_row_tiles, compute_dtype=compute_dtype)

    g_full = pl.pallas_call(
        kernel,
        out_shape=jax.ShapeDtypeStruct((rows, rows), jnp.float32),
        grid_spec=pltpu.PrefetchScalarGridSpec(
            num_scalar_prefetch=0,
            grid=(n_row_tiles, k_tiles),
            in_specs=[pl.BlockSpec((rows, tk), lambda i, k: (0, k))],   # one slab
            out_specs=pl.BlockSpec((tm, rows), lambda i, k: (i, 0)),    # resident
        ),
        compiler_params=pltpu.CompilerParams(
            dimension_semantics=("parallel", "arbitrary"),
            vmem_limit_bytes=vmem_limit),
    )(f)

    return g_full if rows == M else g_full[:M, :M]


def _style_loss_value(G, target):
    # F.mse_loss(G, target), 'mean' reduction.  Tiny (M, M) op kept in plain JAX
    # so the target gram is never resident in VMEM during the k reduction.
    return jnp.mean((G - target) ** 2)


class StyleLoss:
    """JAX/Pallas port of the PyTorch StyleLoss module (forward semantics)."""

    def __init__(self, target_feature, compute_dtype=jnp.bfloat16):
        self.compute_dtype = compute_dtype
        # .detach() -> stop_gradient; gram-only kernel call (no dummy MSE work).
        self.target = jax.lax.stop_gradient(
            gram_matrix(target_feature, compute_dtype=compute_dtype))
        self.loss = None

    def __call__(self, x):
        G = gram_matrix(x, compute_dtype=self.compute_dtype)
        # NOTE: side-effecting attribute mirrors the PyTorch module; under jit
        # prefer the pure helpers gram_matrix / _style_loss_value.
        self.loss = _style_loss_value(G, self.target)
        return x                 # forward returns the input unchanged


def _gram_ref(x):
    a, b, c, d = x.shape
    f = x.reshape(a * b, c * d).astype(jnp.float32)
    return (f @ f.T) / (a * b * c * d)


if __name__ == "__main__":
    key = jax.random.PRNGKey(0)
    k_tgt, k_in, k_odd, k_big = jax.random.split(key, 4)

    # NCHW, small shapes: batch=2, channels=4, spatial=16 -> features (8, 256)
    target_feature = jax.random.normal(k_tgt, (2, 4, 16, 16), jnp.float32)
    x = jax.random.normal(k_in, (2, 4, 16, 16), jnp.float32)

    g_ref_tgt = _gram_ref(target_feature)
    g_ref_in = _gram_ref(x)
    loss_ref = jnp.mean((g_ref_in - g_ref_tgt) ** 2)

    # --- f32 path: exact check against the pure-JAX reference ---------------
    mod_f32 = StyleLoss(target_feature, compute_dtype=jnp.float32)
    out = mod_f32(x)
    jax.block_until_ready(out)
    jax.block_until_ready(mod_f32.loss)
    assert jnp.allclose(mod_f32.target, g_ref_tgt, rtol=1e-5, atol=1e-5)
    assert jnp.allclose(mod_f32.loss, loss_ref, rtol=1e-5, atol=1e-5)
    assert jnp.array_equal(out, x)

    # --- bf16-MXU path (default; recommended on v6e/v7x): loose tolerance ---
    mod_bf16 = StyleLoss(target_feature)              # compute_dtype=bf16
    out_bf = mod_bf16(x)
    jax.block_until_ready(out_bf)
    jax.block_until_ready(mod_bf16.loss)
    assert jnp.allclose(mod_bf16.target, g_ref_tgt, rtol=5e-2, atol=1e-3)
    assert jnp.allclose(mod_bf16.loss, loss_ref, rtol=2.5e-1, atol=1e-5)
    assert jnp.array_equal(out_bf, x)

    # --- K-tail mask + multi-step reduction (K=360, not a tile multiple) ----
    x_odd = jax.random.normal(k_odd, (1, 8, 12, 30), jnp.float32)
    g_odd = gram_matrix(x_odd, compute_dtype=jnp.float32)
    jax.block_until_ready(g_odd)
    assert jnp.allclose(g_odd, _gram_ref(x_odd), rtol=1e-5, atol=1e-5)

    # --- Row-tiled fallback path (forced via a tiny tiling budget) ----------
    x_big = jax.random.normal(k_big, (2, 128, 16, 16), jnp.float32)
    g_big = gram_matrix(x_big, compute_dtype=jnp.float32,
                        vmem_budget_bytes=600 * 1024)
    jax.block_until_ready(g_big)
    assert jnp.allclose(g_big, _gram_ref(x_big), rtol=1e-5, atol=1e-5)

    print("KERNEL_OK")
</pallas_src>

<mosaic_0001>
module attributes {stable_mosaic.version = 11 : i64} {
  func.func @_gram_kernel(%arg0: i32, %arg1: i32, %arg2: memref<8x256xf32, #tpu.memory_space<vmem>>, %arg3: memref<8x8xf32, #tpu.memory_space<vmem>>) attributes {dimension_semantics = [#tpu.dimension_semantics<parallel>, #tpu.dimension_semantics<arbitrary>], iteration_bounds = array<i64: 1, 1>, scalar_prefetch = 0 : i64, scratch_operands = 0 : i64, tpu.core_type = #tpu.core_type<tc>, window_params = [{transform_indices = @transform_0, window_bounds = array<i64: 8, 256>}, {transform_indices = @transform_1, window_bounds = array<i64: 8, 8>}]} {
    %c0_i32 = arith.constant 0 : i32
    %0 = arith.cmpi eq, %arg1, %c0_i32 : i32
    %1 = arith.extui %0 : i1 to i32
    %c0_i32_0 = arith.constant 0 : i32
    %2 = arith.cmpi ne, %1, %c0_i32_0 : i32
    scf.if %2 {
      %cst_8 = arith.constant 0.000000e+00 : f32
      %11 = vector.broadcast %cst_8 : f32 to vector<8x8xf32>
      %c0_9 = arith.constant 0 : index
      %c0_10 = arith.constant 0 : index
      %12 = vector.load %arg3[%c0_9, %c0_10] : memref<8x8xf32, #tpu.memory_space<vmem>>, vector<8x8xf32>
      tpu.vector_store %arg3[%c0_9, %c0_10], %11 {strides = array<i32>} : memref<8x8xf32, #tpu.memory_space<vmem>>, vector<8x8xf32>,
    } else {
    }
    %c0 = arith.constant 0 : index
    %c0_1 = arith.constant 0 : index
    %3 = vector.load %arg2[%c0, %c0_1] : memref<8x256xf32, #tpu.memory_space<vmem>>, vector<8x256xf32>
    %c0_2 = arith.constant 0 : index
    %c0_3 = arith.constant 0 : index
    %4 = vector.load %arg3[%c0_2, %c0_3] : memref<8x8xf32, #tpu.memory_space<vmem>>, vector<8x8xf32>
    %cst = arith.constant dense<0.000000e+00> : vector<8x8xf32>
    %5 = tpu.matmul %3, %3, %cst {dimension_numbers = #tpu.dot_dimension_numbers<[1], [1], [0], [0], [0, 0, 1, 0], [], []>} : vector<8x256xf32>, vector<8x256xf32>, vector<8x8xf32> -> vector<8x8xf32>
    %6 = arith.addf %4, %5 : vector<8x8xf32>
    %c0_4 = arith.constant 0 : index
    %c0_5 = arith.constant 0 : index
    %7 = vector.load %arg3[%c0_4, %c0_5] : memref<8x8xf32, #tpu.memory_space<vmem>>, vector<8x8xf32>
    tpu.vector_store %arg3[%c0_4, %c0_5], %6 {strides = array<i32>} : memref<8x8xf32, #tpu.memory_space<vmem>>, vector<8x8xf32>,
    %c0_i32_6 = arith.constant 0 : i32
    %8 = arith.cmpi eq, %arg1, %c0_i32_6 : i32
    %9 = arith.extui %8 : i1 to i32
    %c0_i32_7 = arith.constant 0 : i32
    %10 = arith.cmpi ne, %9, %c0_i32_7 : i32
    scf.if %10 {
      %c0_8 = arith.constant 0 : index
      %c0_9 = arith.constant 0 : index
      %11 = vector.load %arg3[%c0_8, %c0_9] : memref<8x8xf32, #tpu.memory_space<vmem>>, vector<8x8xf32>
      %cst_10 = arith.constant 4.8828125E-4 : f32
      %12 = vector.broadcast %cst_10 : f32 to vector<8x8xf32>
      %13 = arith.mulf %11, %12 : vector<8x8xf32>
      %c0_11 = arith.constant 0 : index
      %c0_12 = arith.constant 0 : index
      %14 = vector.load %arg3[%c0_11, %c0_12] : memref<8x8xf32, #tpu.memory_space<vmem>>, vector<8x8xf32>
      tpu.vector_store %arg3[%c0_11, %c0_12], %13 {strides = array<i32>} : memref<8x8xf32, #tpu.memory_space<vmem>>, vector<8x8xf32>,
    } else {
    }
    return
  }
  func.func @transform_0(%arg0: i32, %arg1: i32) -> (i32, i32) {
    %c0_i32 = arith.constant 0 : i32
    %c0_i32_0 = arith.constant 0 : i32
    return %c0_i32, %arg1 : i32, i32
  }
  func.func @transform_1(%arg0: i32, %arg1: i32) -> (i32, i32) {
    %c0_i32 = arith.constant 0 : i32
    %c0_i32_0 = arith.constant 0 : i32
    return %arg0, %c0_i32 : i32, i32
  }
}

</mosaic_0001>

<bundles_post_ra>
// kernel: tpu_custom_call.1
= control target key start
LH: loop header
LB: loop body
LE: loop exit
PB: predicated region body
PF: predicated region fallthrough
CT: control target
= control target key end

     0   :  { %6 = vsyncpa [#allocation3], 0  ;;  %s175_s0 = inlined_call_operand.hbm [shape: f32[8,256], index: 0, kind: input, shape index: {}]   ;;  %s176_s1 = inlined_call_operand.hbm [shape: f32[8,8], index: 1, kind: output, shape index: {}]  }
   0x1   :  { %7 = vsyncpa [#allocation4], 0  ;;  %s13_s8 = sshll.u32 %s175_s0, 4  ;;  %s153_s9 = smov [#allocation2]   ;;  %s14_s8 = int_to_ptr.hbm [resolvable:$true] %s13_s8 }
   0x2   :  { %s15_s10 = sshll.u32 %s153_s9, 4  ;;  %s16_s10 = int_to_ptr.vmem [resolvable:$true] %s15_s10 }
   0x3   :  { %18 = dma.hbm_to_vmem [thread:$0]  %s14_s8, 256, %s16_s10, [#allocation3]  }
   0x4   :  { %149 = dma.done.wait [#allocation3], 256  }
   0x5   :  { %150 = vsyncadd [#allocation3], 4294967040  ;;  %v29_v0 = vld [vmem:[#allocation2] sm:$0xff]  ;;  %v30_v1 = vld [vmem:[#allocation2 + $0x8] sm:$0xff]  ;;  %vm27_vm0 = vcmask 64512   ;;  %v154_v2 = vmov 0.0  }
   0x6   :  { %47 = vmatpush.xpose.msra.mxu0 %v29_v0  ;;  %67 = vmatpush.xpose.msra.mxu1 %v30_v1  ;;  %28 = vst.msk [vmem:[#allocation5] sm:$0xff] %vm27_vm0, %v154_v2  ;;  %s155_s0 = smov [#allocation5]   ;;  %s88_s14 = sshll.u32 %s176_s1, 4  ;;  %s89_s14 = int_to_ptr.hbm [resolvable:$true] %s88_s14 }
   0x7   :  { %s86_s11 = sshll.u32 %s155_s0, 4  ;;  %s87_s11 = int_to_ptr.vmem [resolvable:$true] %s86_s11 }
   0x9   :  { %48 = vmatmul.f32.vlgmr.msra.gmra.mxu0 %v29_v0  ;;  %68 = vmatmul.f32.vlgmr.msra.gmra.mxu1 %v30_v1 }
   0xd   :  { %v31_v4 = vld [vmem:[#allocation5] sm:$0xff] }
  0x86   :  { %v49_v3 = vpop.f32.mrf.mxu0  ;;  %v69_v5 = vpop.f32.mrf.mxu1 }
  0x87   :  { %v70_v6 = vadd.f32 %v69_v5, %v49_v3 }
  0x89   :  { %v72_v7 = vadd.f32 %v70_v6, %v31_v4 }
  0x8b   :  { %74 = vst.msk [vmem:[#allocation5] sm:$0xff] %vm27_vm0, %v72_v7 }
  0x92   :  { %v78_v8 = vld [vmem:[#allocation5] sm:$0xff] }
  0x93   :  { %v79_v9 = vmul.f32 0.00048828125, %v78_v8 }
  0x95   :  { %80 = vst.msk [vmem:[#allocation5] sm:$0xff] %vm27_vm0, %v79_v9 }
  0x96   :  { %91 = dma.vmem_to_hbm [thread:$0]  %s87_s11, 128, %s89_s14, [#allocation4]  }
  0x97   :  { %151 = dma.done.wait [#allocation4], 128  }
  0x98   :  { %152 = vsyncadd [#allocation4], 4294967168 }
  0x99   :  { %96 = vsyncpa [#allocation3], 1 }
  0x9a   :  { %97 = vsyncpa [#allocation4], 1 }

</bundles_post_ra>
